<compile_context>
chip_gen: v5e
topology: v5e:2x2
jax: 0.10.0
libtpu: 0.0.40
codegen_flags: <defaults>
</compile_context>

<pallas_src>
import functools

import jax
import jax.numpy as jnp
from jax.experimental import pallas as pl
from jax.experimental.pallas import tpu as pltpu

EPS = 1e-5
_VMEM_LIMIT_BYTES = 32 * 1024 * 1024
# Only keep x resident in VMEM (fused-gather path) if its double-buffered bf16
# footprint stays comfortably below the scoped VMEM limit.
_RESIDENT_X_BUDGET_BYTES = 12 * 1024 * 1024

# Flipped to False the first time the in-kernel dynamic gather fails to lower on
# the installed Mosaic; afterwards we go straight to the XLA-gather fallback.
_FUSED_GATHER_OK = True


def _round_up(n, m):
    return ((n + m - 1) // m) * m


def _ln_linear_max(feats, w, bias, out_ref, k):
    """Shared math: LayerNorm (affine folded into w) -> matmul -> max over k."""
    f = feats.astype(jnp.float32)                                   # (rows, C)

    # Single-pass LayerNorm statistics over the channel dim (f32).
    mean = jnp.mean(f, axis=-1, keepdims=True)
    msq = jnp.mean(f * f, axis=-1, keepdims=True)
    var = jnp.maximum(msq - mean * mean, 0.0)                       # guard cancellation
    xhat = ((f - mean) * jax.lax.rsqrt(var + EPS)).astype(jnp.bfloat16)

    # Linear (gamma folded into w), one MXU matmul with f32 accumulation.
    h = jnp.dot(xhat, w, preferred_element_type=jnp.float32)        # (rows, Coutp)

    # MaxPool1d(k): max over each group of k consecutive rows (sublane reduce).
    # For k a multiple of 8 (typical, and the case in the test) this reshape is a
    # sublane-aligned regroup; for other k it is still correct (may relayout).
    rows, coutp = h.shape
    pooled = jnp.max(h.reshape(rows // k, k, coutp), axis=1)        # (tm, Coutp)

    out_ref[...] = (pooled + bias).astype(out_ref.dtype)


def _fused_kernel(idx_ref, x_ref, w_ref, b_ref, out_ref, *, k):
    # idx_ref : (tm, k)    int32  neighbor indices for this tile of queries
    # x_ref   : (N, C)     bf16   full feature table, resident in VMEM
    # w_ref   : (C, Coutp) bf16   gamma-folded linear weight
    # b_ref   : (1, Coutp) f32    beta @ W (added after the max)
    # out_ref : (tm, Coutp)
    idx = idx_ref[...].reshape(-1)                                  # (tm*k,)
    feats = jnp.take(x_ref[...], idx, axis=0, mode="promise_in_bounds")
    _ln_linear_max(feats, w_ref[...], b_ref[...], out_ref, k)


def _stream_kernel(feats_ref, w_ref, b_ref, out_ref, *, k):
    # feats_ref : (tm*k, C) bf16, pre-gathered neighbor features (XLA-side gather)
    _ln_linear_max(feats_ref[...], w_ref[...], b_ref[...], out_ref, k)


def down_sample(pxo, pko, params, k, *, tm=512, fuse_gather=None):
    """JAX/Pallas equivalent of DownSample.forward.

    pxo = (p, x, o):           p (N,3) coords, x (N,C) feats, o (B,) batch offsets
    pko = (n_p, knn_idx, n_o): n_p (M,3), knn_idx (M,k) int32, n_o (B,)
    params = (gamma, beta, w): LayerNorm weight/bias (C,), Linear weight (C, Cout)
    fuse_gather: None = auto (in-kernel gather if supported & x fits VMEM),
                 True/False to force.
    """
    global _FUSED_GATHER_OK

    p, x, o = pxo
    n_p, knn_idx, n_o = pko
    gamma, beta, w = params

    m, kk = knn_idx.shape
    assert kk == k
    n_pts, c = x.shape
    cout = w.shape[1]
    cout_pad = _round_up(cout, 128)            # lane-dense output stores (no vst.msk)

    # Fold the LayerNorm affine into the linear weight; beta @ W is constant over
    # the pooled window so it is added after the max.
    w32 = w.astype(jnp.float32)
    w_fold = (gamma.astype(jnp.float32)[:, None] * w32).astype(jnp.bfloat16)
    bias = (beta.astype(jnp.float32) @ w32).reshape(1, cout)
    if cout_pad != cout:
        w_fold = jnp.pad(w_fold, ((0, 0), (0, cout_pad - cout)))
        bias = jnp.pad(bias, ((0, 0), (0, cout_pad - cout)))

    # Tile over query points. Pad the tiny (M, k) int32 index array, never the
    # feature slab. Keep >=2 grid steps when possible so v7x megacore splits it.
    tm_eff = min(tm, _round_up(m, 8))
    if _round_up(m, tm_eff) // tm_eff < 2 and tm_eff >= 16:
        tm_eff = _round_up(tm_eff // 2, 8)
    m_pad = _round_up(m, tm_eff)
    idx = knn_idx.astype(jnp.int32)
    if m_pad != m:
        idx = jnp.pad(idx, ((0, m_pad - m), (0, 0)))   # pad rows gather point 0 (sliced off)

    # bf16 feature table: halves the dominant memory traffic / resident footprint.
    # LN statistics are still accumulated in f32 inside the kernel.
    x_bf16 = x.astype(jnp.bfloat16)

    grid = (m_pad // tm_eff,)
    out_shape = jax.ShapeDtypeStruct((m_pad, cout_pad), x.dtype)
    out_spec = pl.BlockSpec((tm_eff, cout_pad), lambda i: (i, 0))
    w_spec = pl.BlockSpec((c, cout_pad), lambda i: (0, 0))          # constant block
    b_spec = pl.BlockSpec((1, cout_pad), lambda i: (0, 0))          # constant block
    cparams = pltpu.CompilerParams(
        dimension_semantics=("parallel",),
        vmem_limit_bytes=_VMEM_LIMIT_BYTES,
    )
    out_bytes = m_pad * cout_pad * jnp.dtype(x.dtype).itemsize
    flops = 2 * m_pad * k * c * cout_pad

    if fuse_gather is None:
        fuse_gather = _FUSED_GATHER_OK and (2 * n_pts * c * 2 <= _RESIDENT_X_BUDGET_BYTES)

    if fuse_gather:
        try:
            out = pl.pallas_call(
                functools.partial(_fused_kernel, k=k),
                out_shape=out_shape,
                grid_spec=pltpu.PrefetchScalarGridSpec(
                    num_scalar_prefetch=0,
                    grid=grid,
                    in_specs=[
                        pl.BlockSpec((tm_eff, k), lambda i: (i, 0)),     # knn indices
                        pl.BlockSpec((n_pts, c), lambda i: (0, 0)),      # resident x
                        w_spec,
                        b_spec,
                    ],
                    out_specs=out_spec,
                ),
                compiler_params=cparams,
                cost_estimate=pl.CostEstimate(
                    flops=flops,
                    transcendentals=m_pad * k,
                    bytes_accessed=n_pts * c * 2 + m_pad * k * 4 + out_bytes,
                ),
            )(idx, x_bf16, w_fold, bias)
            return (out[:m, :cout], n_p, n_o)
        except Exception:
            # In-kernel dynamic gather not supported by this Mosaic version (or
            # runtime failure); remember that and use the streaming fallback.
            _FUSED_GATHER_OK = False

    # Fallback: XLA gathers the (m_pad*k, C) bf16 slab once; the kernel streams it.
    feats = jnp.take(x_bf16, idx.reshape(-1), axis=0)               # (m_pad*k, C)
    out = pl.pallas_call(
        functools.partial(_stream_kernel, k=k),
        out_shape=out_shape,
        grid_spec=pltpu.PrefetchScalarGridSpec(
            num_scalar_prefetch=0,
            grid=grid,
            in_specs=[
                pl.BlockSpec((tm_eff * k, c), lambda i: (i, 0)),        # gathered feats
                w_spec,
                b_spec,
            ],
            out_specs=out_spec,
        ),
        compiler_params=cparams,
        cost_estimate=pl.CostEstimate(
            flops=flops,
            transcendentals=m_pad * k,
            bytes_accessed=m_pad * k * c * 2 + out_bytes,
        ),
    )(feats, w_fold, bias)
    return (out[:m, :cout], n_p, n_o)


def _reference(pxo, pko, params, k):
    """Pure-JAX f32 reference (unfused, matches the PyTorch module)."""
    p, x, o = pxo
    n_p, knn_idx, n_o = pko
    gamma, beta, w = params
    feats = jnp.take(x, knn_idx, axis=0).astype(jnp.float32)        # (M, k, C)
    mean = jnp.mean(feats, axis=-1, keepdims=True)
    var = jnp.mean((feats - mean) ** 2, axis=-1, keepdims=True)
    y = (feats - mean) * jax.lax.rsqrt(var + EPS) * gamma + beta
    h = jnp.einsum("mkc,co->mko", y, w.astype(jnp.float32))
    return jnp.max(h, axis=1)


if __name__ == "__main__":
    key = jax.random.PRNGKey(0)
    k_n, k_x, k_p, k_np, k_idx, k_w, k_g, k_b = jax.random.split(key, 8)

    # Small, module-consistent shapes: batch=2, N=64 points -> M=16 downsampled,
    # in_channels=32, out_channels=64, k=8 neighbors.
    N, M, C, Cout, K = 64, 16, 32, 64, 8

    p = jax.random.normal(k_p, (N, 3), dtype=jnp.float32)
    x = jax.random.normal(k_x, (N, C), dtype=jnp.float32)
    o = jnp.array([N // 2, N], dtype=jnp.int32)                     # batch offsets

    n_p = jax.random.normal(k_np, (M, 3), dtype=jnp.float32)
    knn_idx = jax.random.randint(k_idx, (M, K), 0, N, dtype=jnp.int32)
    n_o = jnp.array([M // 2, M], dtype=jnp.int32)

    # Non-trivial LayerNorm affine so the weight-folding path is exercised.
    gamma = 1.0 + 0.1 * jax.random.normal(k_g, (C,), dtype=jnp.float32)
    beta = 0.1 * jax.random.normal(k_b, (C,), dtype=jnp.float32)
    w = jax.random.normal(k_w, (C, Cout), dtype=jnp.float32) * 0.05  # Linear weight^T (in, out)

    pxo = (p, x, o)
    pko = (n_p, knn_idx, n_o)
    params = (gamma, beta, w)

    ref = _reference(pxo, pko, params, K)

    # Default path: fused in-kernel gather if supported, else auto-fallback.
    feats_out, out_np, out_no = down_sample(pxo, pko, params, K)
    feats_out = jax.block_until_ready(feats_out)
    assert feats_out.shape == (M, Cout), feats_out.shape
    assert jnp.allclose(feats_out, ref, atol=2e-2, rtol=2e-2), "mismatch vs reference"

    # Streaming fallback path + small tile: exercises the multi-step grid and the
    # XLA-gather code path regardless of in-kernel gather support.
    feats_out2, _, _ = down_sample(pxo, pko, params, K, tm=8, fuse_gather=False)
    feats_out2 = jax.block_until_ready(feats_out2)
    assert feats_out2.shape == (M, Cout), feats_out2.shape
    assert jnp.allclose(feats_out2, ref, atol=2e-2, rtol=2e-2), "mismatch vs reference (stream)"

    print("KERNEL_OK")
</pallas_src>

<mosaic_0001>
module attributes {stable_mosaic.version = 11 : i64} {
  func.func @_stream_kernel(%arg0: i32, %arg1: memref<64x32xbf16, #tpu.memory_space<vmem>>, %arg2: memref<32x128xbf16, #tpu.memory_space<vmem>>, %arg3: memref<1x128xf32, #tpu.memory_space<vmem>>, %arg4: memref<8x128xf32, #tpu.memory_space<vmem>>) attributes {dimension_semantics = [#tpu.dimension_semantics<parallel>], iteration_bounds = array<i64: 2>, scalar_prefetch = 0 : i64, scratch_operands = 0 : i64, tpu.core_type = #tpu.core_type<tc>, window_params = [{transform_indices = @transform_0, window_bounds = array<i64: 64, 32>}, {pipeline_mode = #tpu.pipeline_mode<synchronous>, transform_indices = @transform_1, window_bounds = array<i64: 32, 128>}, {pipeline_mode = #tpu.pipeline_mode<synchronous>, transform_indices = @transform_2, window_bounds = array<i64: 1, 128>}, {transform_indices = @transform_3, window_bounds = array<i64: 8, 128>}]} {
    %c0 = arith.constant 0 : index
    %c0_0 = arith.constant 0 : index
    %0 = vector.load %arg1[%c0, %c0_0] : memref<64x32xbf16, #tpu.memory_space<vmem>>, vector<64x32xbf16>
    %c0_1 = arith.constant 0 : index
    %c0_2 = arith.constant 0 : index
    %1 = vector.load %arg2[%c0_1, %c0_2] : memref<32x128xbf16, #tpu.memory_space<vmem>>, vector<32x128xbf16>
    %c0_3 = arith.constant 0 : index
    %c0_4 = arith.constant 0 : index
    %2 = vector.load %arg3[%c0_3, %c0_4] : memref<1x128xf32, #tpu.memory_space<vmem>>, vector<1x128xf32>
    %3 = arith.extf %0 : vector<64x32xbf16> to vector<64x32xf32>
    %cst = arith.constant dense<0.000000e+00> : vector<64xf32>
    %4 = vector.multi_reduction <add>, %3, %cst [1] : vector<64x32xf32> to vector<64xf32>
    %5 = vector.shape_cast %4 : vector<64xf32> to vector<64x1xf32>
    %cst_5 = arith.constant 3.200000e+01 : f32
    %6 = vector.broadcast %cst_5 : f32 to vector<64x1xf32>
    %7 = arith.divf %5, %6 : vector<64x1xf32>
    %8 = arith.mulf %3, %3 : vector<64x32xf32>
    %cst_6 = arith.constant dense<0.000000e+00> : vector<64xf32>
    %9 = vector.multi_reduction <add>, %8, %cst_6 [1] : vector<64x32xf32> to vector<64xf32>
    %10 = vector.shape_cast %9 : vector<64xf32> to vector<64x1xf32>
    %cst_7 = arith.constant 3.200000e+01 : f32
    %11 = vector.broadcast %cst_7 : f32 to vector<64x1xf32>
    %12 = arith.divf %10, %11 : vector<64x1xf32>
    %13 = arith.mulf %7, %7 : vector<64x1xf32>
    %14 = arith.subf %12, %13 : vector<64x1xf32>
    %cst_8 = arith.constant 0.000000e+00 : f32
    %15 = vector.broadcast %cst_8 : f32 to vector<64x1xf32>
    %16 = arith.maximumf %14, %15 : vector<64x1xf32>
    %17 = vector.broadcast %7 : vector<64x1xf32> to vector<64x32xf32>
    %18 = arith.subf %3, %17 : vector<64x32xf32>
    %cst_9 = arith.constant 9.99999974E-6 : f32
    %19 = vector.broadcast %cst_9 : f32 to vector<64x1xf32>
    %20 = arith.addf %16, %19 : vector<64x1xf32>
    %21 = math.rsqrt %20 : vector<64x1xf32>
    %22 = vector.broadcast %21 : vector<64x1xf32> to vector<64x32xf32>
    %23 = arith.mulf %18, %22 : vector<64x32xf32>
    %24 = arith.truncf %23 : vector<64x32xf32> to vector<64x32xbf16>
    %cst_10 = arith.constant dense<0.000000e+00> : vector<64x128xf32>
    %25 = tpu.matmul %24, %1, %cst_10 {dimension_numbers = #tpu.dot_dimension_numbers<[1], [0], [0], [1], [0, 0, 1, 1], [], []>} : vector<64x32xbf16>, vector<32x128xbf16>, vector<64x128xf32> -> vector<64x128xf32>
    %26 = vector.shape_cast %25 : vector<64x128xf32> to vector<8x8x128xf32>
    %cst_11 = arith.constant dense<0xFF800000> : vector<8x128xf32>
    %27 = vector.multi_reduction <maximumf>, %26, %cst_11 [1] : vector<8x8x128xf32> to vector<8x128xf32>
    %28 = vector.broadcast %2 : vector<1x128xf32> to vector<8x128xf32>
    %29 = arith.addf %27, %28 : vector<8x128xf32>
    %c0_12 = arith.constant 0 : index
    %c0_13 = arith.constant 0 : index
    %30 = vector.load %arg4[%c0_12, %c0_13] : memref<8x128xf32, #tpu.memory_space<vmem>>, vector<8x128xf32>
    tpu.vector_store %arg4[%c0_12, %c0_13], %29 {strides = array<i32>} : memref<8x128xf32, #tpu.memory_space<vmem>>, vector<8x128xf32>,
    return
  }
  func.func @transform_0(%arg0: i32) -> (i32, i32) {
    %c0_i32 = arith.constant 0 : i32
    %c0_i32_0 = arith.constant 0 : i32
    return %arg0, %c0_i32 : i32, i32
  }
  func.func @transform_1(%arg0: i32) -> (i32, i32) {
    %c0_i32 = arith.constant 0 : i32
    %c0_i32_0 = arith.constant 0 : i32
    %c0_i32_1 = arith.constant 0 : i32
    return %c0_i32, %c0_i32_0 : i32, i32
  }
  func.func @transform_2(%arg0: i32) -> (i32, i32) {
    %c0_i32 = arith.constant 0 : i32
    %c0_i32_0 = arith.constant 0 : i32
    %c0_i32_1 = arith.constant 0 : i32
    return %c0_i32, %c0_i32_0 : i32, i32
  }
  func.func @transform_3(%arg0: i32) -> (i32, i32) {
    %c0_i32 = arith.constant 0 : i32
    %c0_i32_0 = arith.constant 0 : i32
    return %arg0, %c0_i32 : i32, i32
  }
}

</mosaic_0001>

<bundles_post_ra>
// kernel: tpu_custom_call.1
= control target key start
LH: loop header
LB: loop body
LE: loop exit
PB: predicated region body
PF: predicated region fallthrough
CT: control target
= control target key end

     0   :  { %8 = vsyncpa [#allocation3], 0  ;;  %s1128_s0 = inlined_call_operand.vmem [shape: bf16[128,32], index: 0, kind: input, shape index: {}]   ;;  %s1129_s1 = inlined_call_operand.vmem [shape: bf16[32,128], index: 1, kind: input, shape index: {}]   ;;  %s1130_s2 = inlined_call_operand.vmem [shape: f32[1,128], index: 2, kind: input, shape index: {}]   ;;  %s1131_s3 = inlined_call_operand.hbm [shape: f32[16,128], index: 3, kind: output, shape index: {}]  }
   0x1   :  { %10 = vsyncpa [#allocation3 + $0x1], 0  ;;  %s817_s12 = smov 0   ;;  %s819_s13 = smov 0  }
   0x2   :  { %s821_s14 = smov 0   ;;  %s823_s15 = smov 0  }
   0x3 LB: > { %s622_s16 = sadd.s32 4294967295, %s794_s15   ;;  %s623_s17 = sadd.s32 4294967294, %s794_s15   ;;  %s794_s15 = sphi %s823_s15, %s1141_s15   ;;  %s790_s14 = sphi %s821_s14, %s1140_s14   ;;  %s786_s13 = sphi %s819_s13, %s1139_s13   ;;  %s782_s12 = sphi %s817_s12, %s1138_s12  }
   0x4   : > { %s840_s18 = sadd.s32 1, %s794_s15   ;;  %s91_s19 = sadd.s32 1, %s790_s14 }
   0x5   : > { %s88_s20 = ssub.s32 %s794_s15, %s840_s18  ;;  %p101_p0 = scmp.ne.s32.totalorder %s790_s14, %s786_s13 }
   0x6   : > { %p89_p1 = scmp.eq.s32.totalorder %s88_s20, 0  ;;  %p102_p2 = scmp.eq.s32.totalorder %s622_s16, 1 }
   0x7   : > { %p107_p3 = scmp.ne.s32.totalorder %s786_s13, %s782_s12  ;;  %p108_p4 = scmp.eq.s32.totalorder %s623_s17, 1 }
   0x8   : > { %s850_s21 = scalar_select %p89_p1, %s790_s14, %s91_s19  }
   0x9   : > { %p852_p5 = por %p102_p2, %p101_p0  ;;  %p856_p6 = por %p108_p4, %p107_p3 }
   0xa   : > { %p626_p7 = scmp.ge.s32.totalorder %s794_s15, 1  ;;  %p141_p8 = scmp.lt.s32.totalorder %s794_s15, 3 }
   0xc   : > { %p142_p9 = pnand %p626_p7, %p141_p8 }
   0xd   : > { %s862_s24 = sshll.u32 (!%p142_p9), %s622_s16, 3  ;;  %s162_s9 = sand.u32 (!%p142_p9), 1, %s786_s13  }
   0xe   : > { %145 = sbr.rel (%p142_p9) target bundleno = 371 (0x173), region = 32  ;;  %p166_p10 = scmp.lt.s32.totalorder (!%p142_p9), %s862_s24, 15 }
   0xf   : > { %s1092_s10 = sshll.u32 (!%p142_p9), %s162_s9, 3  ;;  %s559_s17 = scalar_lea.hbm (!%p142_p9), %s1131_s3, %s862_s24 }
  0x10   : > { %s164_s19 = scalar_lea.vmem (!%p142_p9), [#allocation2], %s1092_s10  ;;  %s752_s30 = scalar_lea.hbm (!%p142_p9), %s1131_s3, 16 }
  0x11   : > { %s561_s20 = sshll.u32 (!%p142_p9), %s164_s19, 4  ;;  %s562_s20 = int_to_ptr.vmem [resolvable:$true] %s561_s20 }
  0x13   : > { %s167_s25 = scalar_select %p166_p10, %s862_s24, 15  ;;  %vm193_vm0 = vcmask 261120   ;;  %v796_v36 = vmov 32.0   ;;  %v647_v48 = vld [vmem:[%s1129_s1 + $0x8] sm:$0xff]  ;;  %v646_v51 = vld [vmem:[%s1129_s1] sm:$0xff] }
  0x14   : > { %714 = vrcp.f32 %v796_v36  ;;  %668 = vmatpush.bf16.msra.mxu2 %v647_v48  ;;  %435 = vmatpush.bf16.msra.mxu0 %v647_v48  ;;  %s549_s24 = scalar_lea.sflag [#allocation3], %s162_s9 }
  0x15   : > { %s629_s26 = sshll.u32 %s167_s25, 2  ;;  %669 = vmatpush.bf16.msra.mxu3 %v647_v48  ;;  %667 = vmatpush.bf16.msra.mxu1 %v647_v48  ;;  %s563_s25 = sshll.u32 %s559_s17, 4  ;;  %s564_s25 = int_to_ptr.hbm [resolvable:$true] %s563_s25 }
  0x16   : > { %s169_s29 = scalar_lea.vmem %s1128_s0, %s629_s26  ;;  %s746_s26 = sshra.s32 %s564_s25, 4  ;;  %s747_s26 = int_to_ptr.hbm [resolvable:$true] %s746_s26 }
  0x17   : > { %v666_v0 = vld [vmem:[%s169_s29 + $0x18] sm:$0xff]   ;;  %v665_v1 = vld [vmem:[%s169_s29 + $0x10] sm:$0xff]   ;;  %v649_v2 = vld [vmem:[%s169_s29] sm:$0xff]   ;;  %s748_s27 = scalar_lea.hbm %s747_s26, 8  ;;  %p753_p0 = scmp.lt.s32.totalorder %s747_s26, %s1131_s3 }
  0x18   : > { %v869_v3 = vunpack.c.l.bf16 %v666_v0  ;;  %v871_v4 = vunpack.c.l.bf16 %v665_v1  ;;  %v873_v5 = vunpack.c.l.bf16 %v649_v2  ;;  %v881_v9 = vunpack.c.h.bf16 %v666_v0  ;;  %v664_v15 = vld [vmem:[%s169_s29 + $0x8] sm:$0xff]   ;;  %671 = vmatpush.bf16.msra.mxu2 %v646_v51  ;;  %436 = vmatpush.bf16.msra.mxu0 %v646_v51  ;;  %p749_p11 = scmp.ne.s32.totalorder %s747_s26, %s748_s27  ;;  %p754_p1 = scmp.lt.s32.totalorder %s752_s30, %s748_s27 }
  0x19   : > { %v883_v10 = vunpack.c.h.bf16 %v665_v1  ;;  %v885_v11 = vunpack.c.h.bf16 %v649_v2  ;;  %v895_v17 = vunpack.c.l.bf16 %v664_v15  ;;  %v903_v22 = vunpack.c.h.bf16 %v664_v15  ;;  %672 = vmatpush.bf16.msra.mxu3 %v646_v51  ;;  %670 = vmatpush.bf16.msra.mxu1 %v646_v51 }
  0x1a   : > { %v212_v6 = vsel %vm193_vm0, %v869_v3, 0.0  ;;  %v206_v7 = vsel %vm193_vm0, %v871_v4, 0.0  ;;  %v194_v8 = vsel %vm193_vm0, %v873_v5, 0.0  ;;  %v215_v12 = vsel %vm193_vm0, %v881_v9, 0.0  ;;  %v715_v37 = vpop.eup %714  ;;  %p750_p12 = pnand %p749_p11, %p852_p5  ;;  %p755_p2 = por %p754_p1, %p753_p0 }
  0x1b   : > { %213 = vadd.xlane.f32.xlu2 %v212_v6  ;;  %207 = vadd.xlane.f32.xlu0 %v206_v7  ;;  %v209_v13 = vsel %vm193_vm0, %v883_v10, 0.0  ;;  %v197_v14 = vsel %vm193_vm0, %v885_v11, 0.0  ;;  %v237_v16 = vmul.f32 %v871_v4, %v871_v4  ;;  %v238_v18 = vmul.f32 %v883_v10, %v883_v10 }
  0x1c   : > { %195 = vadd.xlane.f32.xlu1 %v194_v8  ;;  %v200_v20 = vsel %vm193_vm0, %v895_v17, 0.0  ;;  %v234_v23 = vmul.f32 %v885_v11, %v885_v11  ;;  %v233_v24 = vmul.f32 %v873_v5, %v873_v5  ;;  %v203_v25 = vsel %vm193_vm0, %v903_v22, 0.0  ;;  %p751_p13 = pneg %p750_p12 }
  0x1d   : > { %v253_v19 = vsel %vm193_vm0, %v237_v16, 0.0  ;;  %v256_v21 = vsel %vm193_vm0, %v238_v18, 0.0  ;;  %v239_v28 = vmul.f32 %v869_v3, %v869_v3  ;;  %v235_v29 = vmul.f32 %v895_v17, %v895_v17 }
  0x1e   : > { %v244_v26 = vsel %vm193_vm0, %v234_v23, 0.0  ;;  %v241_v27 = vsel %vm193_vm0, %v233_v24, 0.0  ;;  %v240_v30 = vmul.f32 %v881_v9, %v881_v9  ;;  %v236_v34 = vmul.f32 %v903_v22, %v903_v22  ;;  %p756_p3 = pnand %p755_p2, %p751_p13 }
  0x1f   : > { %v259_v31 = vsel %vm193_vm0, %v239_v28, 0.0  ;;  %v247_v32 = vsel %vm193_vm0, %v235_v29, 0.0  ;;  %v219_v38 = vmul.f32 32.0, %v715_v37  ;;  %vm223_vm1 = vweird.f32 %v715_v37 }
  0x20   : > { %v262_v33 = vsel %vm193_vm0, %v240_v30, 0.0  ;;  %v250_v35 = vsel %vm193_vm0, %v236_v34, 0.0 }
  0x21   : > { %v220_v39 = vsub.f32 1.0, %v219_v38 }
  0x23   : > { %216 = vadd.xlane.f32.xlu2 %v215_v12  ;;  %210 = vadd.xlane.f32.xlu0 %v209_v13  ;;  %v221_v43 = vmul.f32 %v715_v37, %v220_v39 }
  0x24   : > { %198 = vadd.xlane.f32.xlu1 %v197_v14 }
  0x25   : > { %v222_v44 = vadd.f32 %v715_v37, %v221_v43 }
  0x27   : > { %v928_v49 = vsel %vm223_vm1, %v715_v37, %v222_v44 }
  0x2b   : > { %254 = vadd.xlane.f32.xlu0 %v253_v19  ;;  %201 = vadd.xlane.f32.xlu2 %v200_v20 }
  0x2c   : > { %257 = vadd.xlane.f32.xlu1 %v256_v21 }
  0x33   : > { %204 = vadd.xlane.f32.xlu0 %v203_v25  ;;  %245 = vadd.xlane.f32.xlu2 %v244_v26 }
  0x34   : > { %242 = vadd.xlane.f32.xlu1 %v241_v27 }
  0x3b   : > { %260 = vadd.xlane.f32.xlu0 %v259_v31  ;;  %248 = vadd.xlane.f32.xlu2 %v247_v32 }
  0x3c   : > { %263 = vadd.xlane.f32.xlu1 %v262_v33 }
  0x43   : > { %251 = vadd.xlane.f32.xlu0 %v250_v35 }
  0x8e   : > { %v214_v40 = vpop.xlane.xlu2 %213  ;;  %v208_v41 = vpop.xlane.xlu0 %207 }
  0x8f   : > { %v196_v42 = vpop.xlane.xlu1 %195  ;;  %v931_v50 = vmul.f32 %v928_v49, %v208_v41  ;;  %v964_v20 = vmul.f32 %v928_v49, %v214_v40 }
  0x90   : > { %v949_v0 = vmul.f32 %v928_v49, %v196_v42 }
  0x91   : > { %v277_v55 = vmul.f32 %v931_v50, %v931_v50  ;;  %v279_v33 = vmul.f32 %v964_v20, %v964_v20 }
  0x92   : > { %v273_v15 = vmul.f32 %v949_v0, %v949_v0 }
  0x96   : > { %v217_v45 = vpop.xlane.xlu2 %216  ;;  %v211_v46 = vpop.xlane.xlu0 %210 }
  0x97   : > { %v199_v47 = vpop.xlane.xlu1 %198  ;;  %v937_v52 = vmul.f32 %v928_v49, %v211_v46  ;;  %v967_v23 = vmul.f32 %v928_v49, %v217_v45 }
  0x98   : > { %v946_v62 = vmul.f32 %v928_v49, %v199_v47 }
  0x99   : > { %v278_v58 = vmul.f32 %v937_v52, %v937_v52  ;;  %v280_v36 = vmul.f32 %v967_v23, %v967_v23 }
  0x9a   : > { %v274_v12 = vmul.f32 %v946_v62, %v946_v62 }
  0x9e   : > { %v255_v53 = vpop.xlane.xlu0 %254  ;;  %v202_v54 = vpop.xlane.xlu2 %201 }
  0x9f   : > { %v269_v56 = vmul.f32 %v255_v53, %v928_v49  ;;  %v258_v57 = vpop.xlane.xlu1 %257  ;;  %v972_v26 = vmul.f32 %v928_v49, %v202_v54 }
  0xa0   : > { %v270_v59 = vmul.f32 %v258_v57, %v928_v49 }
  0xa1   : > { %v285_v60 = vsub.f32 %v269_v56, %v277_v55  ;;  %v275_v39 = vmul.f32 %v972_v26, %v972_v26 }
  0xa2   : > { %v286_v61 = vsub.f32 %v270_v59, %v278_v58 }
  0xa3   : > { %v293_v63 = vmax.f32 %v285_v60, 0.0 }
  0xa4   : > { %v294_v1 = vmax.f32 %v286_v61, 0.0 }
  0xa5   : > { %v951_v2 = vadd.f32 1e-05, %v293_v63 }
  0xa6   : > { %v953_v6 = vadd.f32 1e-05, %v294_v1  ;;  %v205_v7 = vpop.xlane.xlu0 %204  ;;  %v246_v8 = vpop.xlane.xlu2 %245 }
  0xa7   : > { %716 = vrsqrt.f32 %v951_v2  ;;  %v266_v13 = vmul.f32 %v246_v8, %v928_v49  ;;  %v243_v14 = vpop.xlane.xlu1 %242  ;;  %v998_v51 = vmul.f32 %v928_v49, %v205_v7  ;;  %vm359_vm2 = vweird.f32 %v951_v2 }
  0xa8   : > { %718 = vrsqrt.f32 %v953_v6  ;;  %v265_v16 = vmul.f32 %v243_v14, %v928_v49  ;;  %vm369_vm6 = vweird.f32 %v953_v6 }
  0xa9   : > { %v282_v18 = vsub.f32 %v266_v13, %v274_v12  ;;  %v276_v12 = vmul.f32 %v998_v51, %v998_v51 }
  0xaa   : > { %v281_v19 = vsub.f32 %v265_v16, %v273_v15 }
  0xab   : > { %v290_v21 = vmax.f32 %v282_v18, 0.0 }
  0xac   : > { %v289_v24 = vmax.f32 %v281_v19, 0.0 }
  0xad   : > { %v969_v25 = vpop.eup %716  ;;  %v974_v27 = vadd.f32 1e-05, %v290_v21 }
  0xae   : > { %v976_v28 = vpop.eup %718  ;;  %v354_v29 = vmul.f32 %v969_v25, %v951_v2  ;;  %v980_v30 = vadd.f32 1e-05, %v289_v24  ;;  %v261_v31 = vpop.xlane.xlu0 %260  ;;  %vm360_vm3 = vweird.f32 %v969_v25 }
  0xaf   : > { %v249_v32 = vpop.xlane.xlu2 %248  ;;  %v364_v34 = vmul.f32 %v976_v28, %v953_v6  ;;  %720 = vrsqrt.f32 %v974_v27  ;;  %v264_v35 = vpop.xlane.xlu1 %263  ;;  %v271_v38 = vmul.f32 %v261_v31, %v928_v49  ;;  %vm1021_vm4 = vmor %vm359_vm2, %vm360_vm3  ;;  %vm370_vm5 = vweird.f32 %v976_v28 }
  0xb0   : > { %v355_v37 = vmul.f32 %v969_v25, %v354_v29  ;;  %722 = vrsqrt.f32 %v980_v30  ;;  %v267_v41 = vmul.f32 %v249_v32, %v928_v49  ;;  %v272_v42 = vmul.f32 %v264_v35, %v928_v49  ;;  %vm371_vm7 = vmor %vm369_vm6, %vm370_vm5 }
  0xb1   : > { %v365_v40 = vmul.f32 %v976_v28, %v364_v34  ;;  %v287_v44 = vsub.f32 %v271_v38, %v279_v33  ;;  %v302_v29 = vsub.f32 %v883_v10, %v937_v52  ;;  %vm329_vm10 = vweird.f32 %v974_v27 }
  0xb2   : > { %v356_v43 = vmul.f32 0.5, %v355_v37  ;;  %v283_v46 = vsub.f32 %v267_v41, %v275_v39  ;;  %v288_v47 = vsub.f32 %v272_v42, %v280_v36  ;;  %v297_v38 = vsub.f32 %v873_v5, %v949_v0 }
  0xb3   : > { %v366_v45 = vmul.f32 0.5, %v365_v40  ;;  %v295_v53 = vmax.f32 %v287_v44, 0.0  ;;  %vm319_vm12 = vweird.f32 %v980_v30 }
  0xb4   : > { %v357_v48 = vsub.f32 1.5, %v356_v43  ;;  %v291_v55 = vmax.f32 %v283_v46, 0.0  ;;  %v296_v56 = vmax.f32 %v288_v47, 0.0 }
  0xb5   : > { %v1000_v54 = vpop.eup %720  ;;  %v1006_v59 = vadd.f32 1e-05, %v295_v53  ;;  %v367_v63 = vsub.f32 1.5, %v366_v45 }
  0xb6   : > { %v723_v57 = vpop.eup %722  ;;  %v324_v58 = vmul.f32 %v1000_v54, %v974_v27  ;;  %v252_v60 = vpop.xlane.xlu0 %251  ;;  %v358_v61 = vmul.f32 %v969_v25, %v357_v48  ;;  %v1010_v7 = vadd.f32 1e-05, %v291_v55  ;;  %v1012_v8 = vadd.f32 1e-05, %v296_v56 }
  0xb7   : > { %v314_v1 = vmul.f32 %v723_v57, %v980_v30  ;;  %724 = vrsqrt.f32 %v1006_v59  ;;  %v268_v14 = vmul.f32 %v252_v60, %v928_v49  ;;  %v301_v49 = vsub.f32 %v871_v4, %v931_v50 }
  0xb8   : > { %v325_v13 = vmul.f32 %v1000_v54, %v324_v58  ;;  %726 = vrsqrt.f32 %v1010_v7  ;;  %v362_v21 = vsel %vm1021_vm4, %v969_v25, %v358_v61  ;;  %v368_v24 = vmul.f32 %v976_v28, %v367_v63 }
  0xb9   : > { %v315_v16 = vmul.f32 %v723_v57, %v314_v1  ;;  %728 = vrsqrt.f32 %v1012_v8  ;;  %v284_v19 = vsub.f32 %v268_v14, %v276_v12  ;;  %vm330_vm8 = vweird.f32 %v1000_v54 }
  0xba   : > { %v326_v18 = vmul.f32 0.5, %v325_v13  ;;  %v372_v34 = vsel %vm371_vm7, %v976_v28, %v368_v24  ;;  %v397_v25 = vmul.f32 %v362_v21, %v301_v49  ;;  %vm320_vm9 = vweird.f32 %v723_v57  ;;  %vm1050_vm11 = vmor %vm329_vm10, %vm330_vm8 }
  0xbb   : > { %v316_v2 = vmul.f32 0.5, %v315_v16  ;;  %v292_v32 = vmax.f32 %v284_v19, 0.0  ;;  %v398_v50 = vmul.f32 %v372_v34, %v302_v29  ;;  %v298_v27 = vsub.f32 %v885_v11, %v946_v62  ;;  %vm321_vm13 = vmor %vm319_vm12, %vm320_vm9 }
  0xbc   : > { %v327_v31 = vsub.f32 1.5, %v326_v18  ;;  %vm379_vm15 = vweird.f32 %v1006_v59  ;;  %v303_v58 = vsub.f32 %v869_v3, %v964_v20  ;;  %vm389_vm3 = vweird.f32 %v1012_v8 }
  0xbd   : > { %v317_v33 = vsub.f32 1.5, %v316_v2  ;;  %v725_v35 = vpop.eup %724  ;;  %v1039_v4 = vadd.f32 1e-05, %v292_v32  ;;  %v403_v0 = vpack.c.bf16 %v398_v50, %v397_v25  ;;  %vm339_vm6 = vweird.f32 %v1010_v7 }
  0xbe   : > { %v328_v6 = vmul.f32 %v1000_v54, %v327_v31  ;;  %v1042_v36 = vpop.eup %726  ;;  %v374_v10 = vmul.f32 %v725_v35, %v1006_v59  ;;  %vm380_vm14 = vweird.f32 %v725_v35  ;;  %v304_v59 = vsub.f32 %v881_v9, %v967_v23 }
  0xbf   : > { %v318_v52 = vmul.f32 %v723_v57, %v317_v33  ;;  %v729_v37 = vpop.eup %728  ;;  %v334_v39 = vmul.f32 %v1042_v36, %v1010_v7  ;;  %730 = vrsqrt.f32 %v1039_v4  ;;  %640 = vmatmul.msk.bf16.vlgmr.msra.gmra.mxu2 %vm193_vm0, %v403_v0  ;;  %vm381_vm2 = vmor %vm379_vm15, %vm380_vm14  ;;  %vm340_vm5 = vweird.f32 %v1042_v36 }
  0xc0   : > { %v375_v40 = vmul.f32 %v725_v35, %v374_v10  ;;  %v384_v5 = vmul.f32 %v729_v37, %v1012_v8  ;;  %v332_v30 = vsel %vm1050_vm11, %v1000_v54, %v328_v6  ;;  %vm390_vm1 = vweird.f32 %v729_v37  ;;  %vm341_vm8 = vmor %vm339_vm6, %vm340_vm5 }
  0xc1   : > { %v335_v41 = vmul.f32 %v1042_v36, %v334_v39  ;;  %v322_v42 = vsel %vm321_vm13, %v723_v57, %v318_v52  ;;  %v394_v46 = vmul.f32 %v332_v30, %v298_v27  ;;  %vm391_vm4 = vmor %vm389_vm3, %vm390_vm1  ;;  %vm349_vm9 = vweird.f32 %v1039_v4 }
  0xc2   : > { %v376_v43 = vmul.f32 0.5, %v375_v40  ;;  %v385_v44 = vmul.f32 %v729_v37, %v384_v5  ;;  %v393_v45 = vmul.f32 %v322_v42, %v297_v38  ;;  %v299_v23 = vsub.f32 %v895_v17, %v972_v26 }
  0xc3   : > { %v336_v11 = vmul.f32 0.5, %v335_v41  ;;  %v300_v16 = vsub.f32 %v903_v22, %v998_v51  ;;  %vm529_vm11 = vcmask 1042434   ;;  %vm532_vm12 = vcmask 1043459  }
  0xc4   : > { %v377_v62 = vsub.f32 1.5, %v376_v43  ;;  %v386_v47 = vmul.f32 0.5, %v385_v44  ;;  %v401_v48 = vpack.c.bf16 %v394_v46, %v393_v45  ;;  %vm535_vm13 = vcmask 1044484  }
  0xc5   : > { %v731_v53 = vpop.eup %730  ;;  %v337_v55 = vsub.f32 1.5, %v336_v11  ;;  %vm538_vm14 = vcmask 1045509   ;;  %vm541_vm15 = vcmask 1046534   ;;  %vm544_vm1 = vcmask 1047559  }
  0xc6   : > { %v387_v56 = vsub.f32 1.5, %v386_v47  ;;  %v344_v57 = vmul.f32 %v731_v53, %v1039_v4  ;;  %638 = vmatmul.msk.bf16.vlgmr.msra.gmra.mxu0 %vm193_vm0, %v401_v48  ;;  %v378_v54 = vmul.f32 %v725_v35, %v377_v62  ;;  %vm350_vm7 = vweird.f32 %v731_v53 }
  0xc7   : > { %v338_v14 = vmul.f32 %v1042_v36, %v337_v55  ;;  %vm351_vm10 = vmor %vm349_vm9, %vm350_vm7 }
  0xc8   : > { %v345_v60 = vmul.f32 %v731_v53, %v344_v57  ;;  %v382_v61 = vsel %vm381_vm2, %v725_v35, %v378_v54  ;;  %v388_v63 = vmul.f32 %v729_v37, %v387_v56  ;;  %v713_v56 = vld [vmem:[%s1130_s2] ss:$0 sm:$0xff] }
  0xc9   : > { %v399_v1 = vmul.f32 %v382_v61, %v303_v58  ;;  %v342_v8 = vsel %vm341_vm8, %v1042_v36, %v338_v14 }
  0xca   : > { %v346_v12 = vmul.f32 0.5, %v345_v60  ;;  %v392_v13 = vsel %vm391_vm4, %v729_v37, %v388_v63  ;;  %v395_v7 = vmul.f32 %v342_v8, %v299_v23 }
  0xcb   : > { %v400_v15 = vmul.f32 %v392_v13, %v304_v59 }
  0xcc   : > { %v347_v3 = vsub.f32 1.5, %v346_v12 }
  0xcd   : > { %v404_v20 = vpack.c.bf16 %v400_v15, %v399_v1 }
  0xce   : > { %v348_v9 = vmul.f32 %v731_v53, %v347_v3 }
  0xcf   : > { %641 = vmatmul.msk.bf16.vlgmr.msra.gmra.mxu3 %vm193_vm0, %v404_v20 }
  0xd0   : > { %v352_v18 = vsel %vm351_vm10, %v731_v53, %v348_v9 }
  0xd1   : > { %v396_v19 = vmul.f32 %v352_v18, %v300_v16 }
  0xd3   : > { %v402_v21 = vpack.c.bf16 %v396_v19, %v395_v7 }
  0xd5   : > { %639 = vmatmul.msk.bf16.vlgmr.msra.gmra.mxu1 %vm193_vm0, %v402_v21  ;;  %vm526_vm0 = vcmask 1041409  }
 0x142   : > { %v448_v2 = vpop.f32.mrf.mxu2 }
 0x143   : > { %v438_v49 = vpop.f32.mrf.mxu0  ;;  %v482_v32 = vrot.slane %v448_v2, 4 }
 0x144   : > { %v458_v33 = vrot.slane %v438_v49, 4 }
 0x145   : > { %v483_v22 = vmax.f32 %v448_v2, %v482_v32 }
 0x146   : > { %v459_v51 = vmax.f32 %v438_v49, %v458_v33 }
 0x147   : > { %v484_v37 = vrot.slane %v483_v22, 2 }
 0x148   : > { %v460_v38 = vrot.slane %v459_v51, 2 }
 0x149   : > { %v485_v0 = vmax.f32 %v483_v22, %v484_v37 }
 0x14a   : > { %v450_v31 = vpop.f32.mrf.mxu2  ;;  %v461_v41 = vmax.f32 %v459_v51, %v460_v38 }
 0x14b   : > { %v440_v24 = vpop.f32.mrf.mxu0  ;;  %v488_v26 = vrot.slane %v450_v31, 4  ;;  %v486_v53 = vrot.slane %v485_v0, 1 }
 0x14c   : > { %v464_v29 = vrot.slane %v440_v24, 4  ;;  %v462_v57 = vrot.slane %v461_v41, 1 }
 0x14d   : > { %v489_v4 = vmax.f32 %v450_v31, %v488_v26  ;;  %v487_v12 = vmax.f32 %v485_v0, %v486_v53 }
 0x14e   : > { %v465_v17 = vmax.f32 %v440_v24, %v464_v29  ;;  %v463_v14 = vmax.f32 %v461_v41, %v462_v57 }
 0x14f   : > { %v490_v28 = vrot.slane %v489_v4, 2  ;;  %v513_v18 = vadd.f32 %v713_v56, %v487_v12 }
 0x150   : > { %v466_v34 = vrot.slane %v465_v17, 2  ;;  %v509_v19 = vadd.f32 %v713_v56, %v463_v14 }
 0x151   : > { %v491_v43 = vmax.f32 %v489_v4, %v490_v28  ;;  %v534_v32 = vrot.slane %v513_v18, 4 }
 0x152   : > { %v453_v25 = vpop.f32.mrf.mxu3  ;;  %v443_v35 = vpop.f32.mrf.mxu1  ;;  %v467_v36 = vmax.f32 %v465_v17, %v466_v34 }
 0x153   : > { %v494_v50 = vrot.slane %v453_v25, 4  ;;  %v470_v6 = vrot.slane %v443_v35, 4  ;;  %v492_v54 = vrot.slane %v491_v43, 1 }
 0x154   : > { %v468_v40 = vrot.slane %v467_v36, 1 }
 0x155   : > { %v495_v10 = vmax.f32 %v453_v25, %v494_v50  ;;  %v471_v52 = vmax.f32 %v443_v35, %v470_v6  ;;  %v493_v15 = vmax.f32 %v491_v43, %v492_v54 }
 0x156   : > { %v469_v62 = vmax.f32 %v467_v36, %v468_v40 }
 0x157   : > { %v472_v39 = vrot.slane %v471_v52, 2  ;;  %v496_v27 = vrot.slane %v495_v10, 2  ;;  %v514_v21 = vadd.f32 %v713_v56, %v493_v15 }
 0x158   : > { %v510_v63 = vadd.f32 %v713_v56, %v469_v62 }
 0x159   : > { %v473_v5 = vmax.f32 %v471_v52, %v472_v39  ;;  %v497_v11 = vmax.f32 %v495_v10, %v496_v27  ;;  %v537_v17 = vrot.slane %v514_v21, 3 }
 0x15a   : > { %v455_v42 = vpop.f32.mrf.mxu3  ;;  %v445_v30 = vpop.f32.mrf.mxu1  ;;  %v525_v9 = vrot.slane %v510_v63, 7 }
 0x15b   : > { %v474_v44 = vrot.slane %v473_v5, 1  ;;  %v500_v45 = vrot.slane %v455_v42, 4  ;;  %v476_v46 = vrot.slane %v445_v30, 4  ;;  %v498_v61 = vrot.slane %v497_v11, 1 }
 0x15c   : > { %v527_v24 = vsel %vm526_vm0, %v525_v9, %v509_v19 }
 0x15d   : > { %v501_v47 = vmax.f32 %v455_v42, %v500_v45  ;;  %v477_v48 = vmax.f32 %v445_v30, %v476_v46  ;;  %v475_v55 = vmax.f32 %v473_v5, %v474_v44  ;;  %v499_v8 = vmax.f32 %v497_v11, %v498_v61 }
 0x15f   : > { %v502_v58 = vrot.slane %v501_v47, 2  ;;  %v478_v60 = vrot.slane %v477_v48, 2  ;;  %v511_v13 = vadd.f32 %v713_v56, %v475_v55  ;;  %v515_v2 = vadd.f32 %v713_v56, %v499_v8 }
 0x161   : > { %v503_v59 = vmax.f32 %v501_v47, %v502_v58  ;;  %v479_v1 = vmax.f32 %v477_v48, %v478_v60  ;;  %v528_v7 = vrot.slane %v511_v13, 6  ;;  %v540_v34 = vrot.slane %v515_v2, 2 }
 0x163   : > { %v504_v3 = vrot.slane %v503_v59, 1  ;;  %v480_v20 = vrot.slane %v479_v1, 1  ;;  %v530_v33 = vsel %vm529_vm11, %v528_v7, %v527_v24 }
 0x165   : > { %v505_v23 = vmax.f32 %v503_v59, %v504_v3  ;;  %v481_v16 = vmax.f32 %v479_v1, %v480_v20 }
 0x167   : > { %v512_v49 = vadd.f32 %v713_v56, %v481_v16  ;;  %v516_v29 = vadd.f32 %v713_v56, %v505_v23 }
 0x169   : > { %v531_v31 = vrot.slane %v512_v49, 5  ;;  %v543_v51 = vrot.slane %v516_v29, 1 }
 0x16b   : > { %v533_v26 = vsel %vm532_vm12, %v531_v31, %v530_v33 }
 0x16c   : > { %v536_v22 = vsel %vm535_vm13, %v534_v32, %v533_v26 }
 0x16d   : > { %v539_v25 = vsel %vm538_vm14, %v537_v17, %v536_v22 }
 0x16e   : > { %v542_v35 = vsel %vm541_vm15, %v540_v34, %v539_v25 }
 0x16f   : > { %v545_v4 = vsel %vm544_vm1, %v543_v51, %v542_v35 }
 0x170   : > { %547 = vst [vmem:[%s164_s19] sm:$0xff] %v545_v4 }
 0x171   : > { %759 = shalt.err (!%p756_p3)
}
 0x172   : > { %673 = dma.vmem_to_hbm [thread:$0]  (%p852_p5), %s562_s20, 128, %s564_s25, %s549_s24  }
 0x173 PF: > { %p679_p4 = scmp.ge.s32.totalorder %s794_s15, 2  ;;  %s575_s6 = sand.u32 1, %s782_s12  }
 0x174   : > { %s576_s7 = scalar_lea.sflag [#allocation3], %s575_s6 }
 0x175   : > { %p676_p7 = pnand %p679_p4, %p856_p6 }
 0x177   : > { %p677_p8 = pneg %p676_p7 }
 0x179   : > { %777 = dma.done.wait (%p677_p8), %s576_s7, 128  }
 0x17a   : > { %779 = vsyncadd (%p677_p8), %s576_s7, 4294967168  ;;  %p13_p9 = scmp.ge.s32.totalorder %s840_s18, 4   ;;  %s1138_s12 = smov %s786_s13 }
 0x17b   : > { %s1139_s13 = smov %s790_s14  ;;  %s1140_s14 = smov %s850_s21 }
 0x17c   : > { %s1141_s15 = smov %s840_s18  ;;  %15 = sbr.rel (!%p13_p9) target bundleno = 3 (0x3), region = 67 }
 0x181   :  { %582 = vsyncpa [#allocation3], 1 }
 0x182   :  { %584 = vsyncpa [#allocation3 + $0x1], 1 }

</bundles_post_ra>
